<compile_context>
chip_gen: v7x
topology: tpu7x:2x2x1
jax: 0.10.0
libtpu: 0.0.40
codegen_flags: <defaults>
</compile_context>

<pallas_src>
import functools

import jax
import jax.numpy as jnp
from jax import lax
from jax.experimental import pallas as pl
from jax.experimental.pallas import tpu as pltpu

LANES = 128
TARGET_BLOCK_ROWS = 8192   # (8192, 128) f32 block = 4 MiB / input / pipeline buffer
ACC_ROWS = 64              # accumulator carry = 2 x 8 vregs (stays in registers)


def _iou_partial_kernel(rows, block_rows, acc_rows, blocks_per_split, total_blocks,
                        has_oob, has_ragged,
                        x_ref, y_ref, out_ref, inter_acc, total_acc):
    c = pl.program_id(0)            # TensorCore split (megacore on v7x)
    i = pl.program_id(1)            # block index within the split (reduction axis)
    blk = c * blocks_per_split + i

    @pl.when(i == 0)
    def _():
        inter_acc[...] = jnp.zeros_like(inter_acc)
        total_acc[...] = jnp.zeros_like(total_acc)

    num_chunks = block_rows // acc_rows

    def load_chunk(off, masked):
        xv = x_ref[pl.ds(off, acc_rows), :].astype(jnp.float32)
        yv = y_ref[pl.ds(off, acc_rows), :].astype(jnp.float32)
        if masked:
            # Zero rows past the logical end of the flattened input (ragged
            # last block only; fully out-of-range blocks are skipped entirely).
            row_ids = (blk * block_rows + off
                       + lax.broadcasted_iota(jnp.int32, (acc_rows, LANES), 0))
            valid = row_ids < rows
            xv = jnp.where(valid, xv, 0.0)
            yv = jnp.where(valid, yv, 0.0)
        return xv, yv

    def accumulate(masked):
        if num_chunks == 1:
            xv, yv = load_chunk(0, masked)
            inter_acc[...] += xv * yv
            total_acc[...] += xv + yv
        else:
            def body(ch, carry):
                inter, tot = carry
                off = pl.multiple_of(ch * acc_rows, acc_rows)
                xv, yv = load_chunk(off, masked)
                return inter + xv * yv, tot + (xv + yv)

            zeros = jnp.zeros((acc_rows, LANES), jnp.float32)
            inter, tot = lax.fori_loop(0, num_chunks, body, (zeros, zeros))
            inter_acc[...] += inter
            total_acc[...] += tot

    if not (has_oob or has_ragged):
        # Common case: every block is full and in range -> no masking at all.
        accumulate(False)
    else:
        full_blocks = total_blocks - 1 if has_ragged else total_blocks

        @pl.when(blk < full_blocks)
        def _():
            accumulate(False)

        if has_ragged:
            @pl.when(blk == total_blocks - 1)
            def _():
                accumulate(True)

    @pl.when(i == pl.num_programs(1) - 1)
    def _():
        out_ref[0, 0] = jnp.sum(inter_acc[...])
        out_ref[0, 1] = jnp.sum(total_acc[...])


def _partial_sums(x2, y2, block_rows_target):
    """Returns (intersection, total) partial sums over a (rows, 128) pair."""
    rows = x2.shape[0]

    block_rows = max((block_rows_target // ACC_ROWS) * ACC_ROWS, ACC_ROWS)
    if rows <= block_rows:
        block_rows = rows          # full-extent block: no (8,128) constraint
        total_blocks = 1
    else:
        total_blocks = pl.cdiv(rows, block_rows)
        if total_blocks > 1 and total_blocks % 2 == 1:
            # Prefer an even block count so the 2-way TensorCore split needs no
            # clamped duplicate-block DMA.
            br = pl.cdiv(pl.cdiv(rows, total_blocks + 1), ACC_ROWS) * ACC_ROWS
            if br >= ACC_ROWS and br < rows and pl.cdiv(rows, br) % 2 == 0:
                block_rows = br
                total_blocks = pl.cdiv(rows, br)

    acc_rows = ACC_ROWS if block_rows % ACC_ROWS == 0 else block_rows

    # 2-way split across TensorCores (v7x megacore); serial no-op on v5e/v6e.
    num_splits = 2 if total_blocks >= 2 else 1
    blocks_per_split = pl.cdiv(total_blocks, num_splits)
    has_oob = num_splits * blocks_per_split != total_blocks
    has_ragged = (rows % block_rows) != 0

    def in_index_map(c, i):
        blk = c * blocks_per_split + i
        # Clamp keeps the DMA in-bounds for a (rare) fully out-of-range block of
        # the 2-way split; its compute is skipped in-kernel.
        return (jnp.minimum(blk, total_blocks - 1), 0)

    kernel = functools.partial(_iou_partial_kernel, rows, block_rows, acc_rows,
                               blocks_per_split, total_blocks, has_oob, has_ragged)

    in_bytes = x2.size * x2.dtype.itemsize + y2.size * y2.dtype.itemsize
    cost = pl.CostEstimate(flops=3 * x2.size, transcendentals=0,
                           bytes_accessed=in_bytes + num_splits * 2 * 4)

    vmem_need = (2 * block_rows * LANES * (x2.dtype.itemsize + y2.dtype.itemsize)
                 + 2 * acc_rows * LANES * 4)
    vmem_limit = int(min(max(2 * vmem_need + (2 << 20), 32 << 20), 48 << 20))

    partials = pl.pallas_call(
        kernel,
        out_shape=jax.ShapeDtypeStruct((num_splits, 2), jnp.float32),
        grid_spec=pltpu.PrefetchScalarGridSpec(
            num_scalar_prefetch=0,
            grid=(num_splits, blocks_per_split),
            in_specs=[
                pl.BlockSpec((block_rows, LANES), in_index_map),
                pl.BlockSpec((block_rows, LANES), in_index_map),
            ],
            out_specs=pl.BlockSpec((1, 2), lambda c, i: (c, 0),
                                   memory_space=pltpu.SMEM),
            scratch_shapes=[
                pltpu.VMEM((acc_rows, LANES), jnp.float32),
                pltpu.VMEM((acc_rows, LANES), jnp.float32),
            ],
        ),
        # If a v7x profile shows one idle TensorCore, switch the leading axis to
        # pltpu.CORE_PARALLEL; "parallel" is the safe choice on all generations.
        compiler_params=pltpu.CompilerParams(
            dimension_semantics=("parallel", "arbitrary"),
            vmem_limit_bytes=vmem_limit,
        ),
        cost_estimate=cost,
    )(x2, y2)

    return jnp.sum(partials[:, 0]), jnp.sum(partials[:, 1])


def iou_loss(inputs, targets, smooth=1.0, block_rows_target=TARGET_BLOCK_ROWS):
    """Pallas TPU implementation of IoULoss.forward. Returns an f32 scalar."""
    x = jnp.reshape(inputs, (-1,))
    y = jnp.reshape(targets, (-1,))
    n = x.shape[0]
    smooth = jnp.float32(smooth)

    if n == 0:
        # intersection = total = union = 0  ->  1 - smooth / smooth == 0
        return jnp.float32(0.0)

    # Non-lane-aligned tail (< 128 elements): reduce it in plain JAX instead of
    # jnp.pad-ing (and copying) the full arrays.
    tail = n % LANES
    intersection = jnp.float32(0.0)
    total = jnp.float32(0.0)
    if tail:
        xt = x[n - tail:].astype(jnp.float32)
        yt = y[n - tail:].astype(jnp.float32)
        intersection += jnp.sum(xt * yt)
        total += jnp.sum(xt + yt)

    n_main = n - tail
    if n_main:
        rows = n_main // LANES
        if tail:
            # Rare ragged case: XLA may materialize the prefix slice once.
            xm, ym = x[:n_main], y[:n_main]
        else:
            # Common case: pure bitcast reshape, zero extra HBM traffic.
            xm, ym = x, y
        inter_k, total_k = _partial_sums(xm.reshape(rows, LANES),
                                         ym.reshape(rows, LANES),
                                         block_rows_target)
        intersection += inter_k
        total += total_k

    union = total - intersection
    return 1.0 - (intersection + smooth) / (union + smooth)


def _ref_iou_loss(inputs, targets, smooth=1.0):
    xi = jnp.reshape(inputs, (-1,)).astype(jnp.float32)
    ti = jnp.reshape(targets, (-1,)).astype(jnp.float32)
    inter = jnp.sum(xi * ti)
    tot = jnp.sum(xi + ti)
    union = tot - inter
    return 1.0 - (inter + smooth) / (union + smooth)


if __name__ == "__main__":
    key = jax.random.PRNGKey(0)
    ks = jax.random.split(key, 8)

    # Primary small test: segmentation-style (N, C, H, W), lane-aligned,
    # single-block path.
    inputs = jax.nn.sigmoid(jax.random.normal(ks[0], (2, 4, 16, 16), jnp.float32))
    targets = (jax.random.uniform(ks[1], (2, 4, 16, 16)) > 0.5).astype(jnp.float32)
    loss = jax.block_until_ready(iou_loss(inputs, targets, smooth=1.0))
    ref = _ref_iou_loss(inputs, targets, smooth=1.0)
    assert jnp.allclose(loss, ref, rtol=1e-5, atol=1e-6), (loss, ref)

    # Multi-block + 2-way split + ragged last block + chunked accumulation
    # (small block_rows_target so a small input exercises the big-input paths).
    a = jax.nn.sigmoid(jax.random.normal(ks[2], (2, 4, 125, 128), jnp.float32))
    b = (jax.random.uniform(ks[3], (2, 4, 125, 128)) > 0.5).astype(jnp.float32)
    l2 = jax.block_until_ready(iou_loss(a, b, smooth=1.0, block_rows_target=128))
    r2 = _ref_iou_loss(a, b, smooth=1.0)
    assert jnp.allclose(l2, r2, rtol=1e-5, atol=1e-6), (l2, r2)

    # Odd block count: exercises the clamped out-of-range block safety net.
    a = jax.nn.sigmoid(jax.random.normal(ks[4], (2, 5, 64, 128), jnp.float32))
    b = (jax.random.uniform(ks[5], (2, 5, 64, 128)) > 0.5).astype(jnp.float32)
    l3 = jax.block_until_ready(iou_loss(a, b, smooth=1.0, block_rows_target=128))
    r3 = _ref_iou_loss(a, b, smooth=1.0)
    assert jnp.allclose(l3, r3, rtol=1e-5, atol=1e-6), (l3, r3)

    # Non-lane-aligned element count (JAX tail path) + bf16 inputs.
    a = jax.nn.sigmoid(jax.random.normal(ks[6], (3, 3, 7, 11), jnp.bfloat16))
    b = (jax.random.uniform(ks[7], (3, 3, 7, 11)) > 0.5).astype(jnp.bfloat16)
    l4 = jax.block_until_ready(iou_loss(a, b, smooth=1.0))
    r4 = _ref_iou_loss(a, b, smooth=1.0)
    assert jnp.allclose(l4, r4, rtol=1e-4, atol=1e-5), (l4, r4)

    print("KERNEL_OK")
</pallas_src>

<mosaic_0001>
module attributes {stable_mosaic.version = 11 : i64} {
  func.func @_iou_partial_kernel(%arg0: i32, %arg1: i32, %arg2: memref<16x128xf32, #tpu.memory_space<vmem>>, %arg3: memref<16x128xf32, #tpu.memory_space<vmem>>, %arg4: memref<1x2xf32, #tpu.memory_space<smem>>, %arg5: memref<16x128xf32, #tpu.memory_space<vmem>>, %arg6: memref<16x128xf32, #tpu.memory_space<vmem>>) attributes {dimension_semantics = [#tpu.dimension_semantics<parallel>, #tpu.dimension_semantics<arbitrary>], iteration_bounds = array<i64: 1, 1>, scalar_prefetch = 0 : i64, scratch_operands = 2 : i64, tpu.core_type = #tpu.core_type<tc>, window_params = [{transform_indices = @transform_0, window_bounds = array<i64: 16, 128>}, {transform_indices = @transform_1, window_bounds = array<i64: 16, 128>}, {transform_indices = @transform_2, window_bounds = array<i64: 1, 2>}]} {
    %c0_i32 = arith.constant 0 : i32
    %0 = arith.cmpi eq, %arg1, %c0_i32 : i32
    %1 = arith.extui %0 : i1 to i32
    %c0_i32_0 = arith.constant 0 : i32
    %2 = arith.cmpi ne, %1, %c0_i32_0 : i32
    scf.if %2 {
      %cst = arith.constant 0.000000e+00 : f32
      %16 = vector.broadcast %cst : f32 to vector<16x128xf32>
      %c0_14 = arith.constant 0 : index
      %c0_15 = arith.constant 0 : index
      %17 = vector.load %arg5[%c0_14, %c0_15] : memref<16x128xf32, #tpu.memory_space<vmem>>, vector<16x128xf32>
      tpu.vector_store %arg5[%c0_14, %c0_15], %16 {strides = array<i32>} : memref<16x128xf32, #tpu.memory_space<vmem>>, vector<16x128xf32>,
      %cst_16 = arith.constant 0.000000e+00 : f32
      %18 = vector.broadcast %cst_16 : f32 to vector<16x128xf32>
      %c0_17 = arith.constant 0 : index
      %c0_18 = arith.constant 0 : index
      %19 = vector.load %arg6[%c0_17, %c0_18] : memref<16x128xf32, #tpu.memory_space<vmem>>, vector<16x128xf32>
      tpu.vector_store %arg6[%c0_17, %c0_18], %18 {strides = array<i32>} : memref<16x128xf32, #tpu.memory_space<vmem>>, vector<16x128xf32>,
    } else {
    }
    %c0 = arith.constant 0 : index
    %c0_1 = arith.constant 0 : index
    %3 = vector.load %arg2[%c0, %c0_1] : memref<16x128xf32, #tpu.memory_space<vmem>>, vector<16x128xf32>
    %c0_2 = arith.constant 0 : index
    %c0_3 = arith.constant 0 : index
    %4 = vector.load %arg3[%c0_2, %c0_3] : memref<16x128xf32, #tpu.memory_space<vmem>>, vector<16x128xf32>
    %c0_4 = arith.constant 0 : index
    %c0_5 = arith.constant 0 : index
    %5 = vector.load %arg5[%c0_4, %c0_5] : memref<16x128xf32, #tpu.memory_space<vmem>>, vector<16x128xf32>
    %6 = arith.mulf %3, %4 : vector<16x128xf32>
    %7 = arith.addf %5, %6 : vector<16x128xf32>
    %c0_6 = arith.constant 0 : index
    %c0_7 = arith.constant 0 : index
    %8 = vector.load %arg5[%c0_6, %c0_7] : memref<16x128xf32, #tpu.memory_space<vmem>>, vector<16x128xf32>
    tpu.vector_store %arg5[%c0_6, %c0_7], %7 {strides = array<i32>} : memref<16x128xf32, #tpu.memory_space<vmem>>, vector<16x128xf32>,
    %c0_8 = arith.constant 0 : index
    %c0_9 = arith.constant 0 : index
    %9 = vector.load %arg6[%c0_8, %c0_9] : memref<16x128xf32, #tpu.memory_space<vmem>>, vector<16x128xf32>
    %10 = arith.addf %3, %4 : vector<16x128xf32>
    %11 = arith.addf %9, %10 : vector<16x128xf32>
    %c0_10 = arith.constant 0 : index
    %c0_11 = arith.constant 0 : index
    %12 = vector.load %arg6[%c0_10, %c0_11] : memref<16x128xf32, #tpu.memory_space<vmem>>, vector<16x128xf32>
    tpu.vector_store %arg6[%c0_10, %c0_11], %11 {strides = array<i32>} : memref<16x128xf32, #tpu.memory_space<vmem>>, vector<16x128xf32>,
    %c0_i32_12 = arith.constant 0 : i32
    %13 = arith.cmpi eq, %arg1, %c0_i32_12 : i32
    %14 = arith.extui %13 : i1 to i32
    %c0_i32_13 = arith.constant 0 : i32
    %15 = arith.cmpi ne, %14, %c0_i32_13 : i32
    scf.if %15 {
      %c0_14 = arith.constant 0 : index
      %c0_15 = arith.constant 0 : index
      %16 = vector.load %arg5[%c0_14, %c0_15] : memref<16x128xf32, #tpu.memory_space<vmem>>, vector<16x128xf32>
      %17 = vector.shape_cast %16 : vector<16x128xf32> to vector<1x16x128xf32>
      %cst = arith.constant dense<0.000000e+00> : vector<1xf32>
      %18 = vector.multi_reduction <add>, %17, %cst [1, 2] : vector<1x16x128xf32> to vector<1xf32>
      %19 = vector.shape_cast %18 : vector<1xf32> to vector<1x1x1xf32>
      %20 = vector.extract %19[0, 0, 0] : f32 from vector<1x1x1xf32>
      %c0_16 = arith.constant 0 : index
      %c0_17 = arith.constant 0 : index
      %21 = memref.load %arg4[%c0_16, %c0_17] : memref<1x2xf32, #tpu.memory_space<smem>>
      memref.store %20, %arg4[%c0_16, %c0_17] : memref<1x2xf32, #tpu.memory_space<smem>>
      %c0_18 = arith.constant 0 : index
      %c0_19 = arith.constant 0 : index
      %22 = vector.load %arg6[%c0_18, %c0_19] : memref<16x128xf32, #tpu.memory_space<vmem>>, vector<16x128xf32>
      %23 = vector.shape_cast %22 : vector<16x128xf32> to vector<1x16x128xf32>
      %cst_20 = arith.constant dense<0.000000e+00> : vector<1xf32>
      %24 = vector.multi_reduction <add>, %23, %cst_20 [1, 2] : vector<1x16x128xf32> to vector<1xf32>
      %25 = vector.shape_cast %24 : vector<1xf32> to vector<1x1x1xf32>
      %26 = vector.extract %25[0, 0, 0] : f32 from vector<1x1x1xf32>
      %c0_21 = arith.constant 0 : index
      %c1 = arith.constant 1 : index
      %27 = memref.load %arg4[%c0_21, %c1] : memref<1x2xf32, #tpu.memory_space<smem>>
      memref.store %26, %arg4[%c0_21, %c1] : memref<1x2xf32, #tpu.memory_space<smem>>
    } else {
    }
    return
  }
  func.func @transform_0(%arg0: i32, %arg1: i32) -> (i32, i32) {
    %c1_i32 = arith.constant 1 : i32
    %0 = arith.muli %arg0, %c1_i32 : i32
    %1 = arith.addi %0, %arg1 : i32
    %c0_i32 = arith.constant 0 : i32
    %2 = arith.minsi %1, %c0_i32 : i32
    %c0_i32_0 = arith.constant 0 : i32
    %c0_i32_1 = arith.constant 0 : i32
    return %2, %c0_i32_0 : i32, i32
  }
  func.func @transform_1(%arg0: i32, %arg1: i32) -> (i32, i32) {
    %c1_i32 = arith.constant 1 : i32
    %0 = arith.muli %arg0, %c1_i32 : i32
    %1 = arith.addi %0, %arg1 : i32
    %c0_i32 = arith.constant 0 : i32
    %2 = arith.minsi %1, %c0_i32 : i32
    %c0_i32_0 = arith.constant 0 : i32
    %c0_i32_1 = arith.constant 0 : i32
    return %2, %c0_i32_0 : i32, i32
  }
  func.func @transform_2(%arg0: i32, %arg1: i32) -> (i32, i32) {
    %c0_i32 = arith.constant 0 : i32
    %c0_i32_0 = arith.constant 0 : i32
    return %arg0, %c0_i32 : i32, i32
  }
}

</mosaic_0001>

<bundles_post_ra>
// kernel: tpu_custom_call.1
= control target key start
LH: loop header
LB: loop body
LE: loop exit
PB: predicated region body
PF: predicated region fallthrough
CT: control target
= control target key end

     0   :  { %7 = vsyncpa [#allocation5], 0  ;;  %s263_s0 = inlined_call_operand.hbm [shape: f32[16,128], index: 0, kind: input, shape index: {}]   ;;  %s264_s1 = inlined_call_operand.hbm [shape: f32[16,128], index: 1, kind: input, shape index: {}]   ;;  %s265_s2 = inlined_call_operand.hbm [shape: f32[1,2], index: 2, kind: output, shape index: {}]  }
   0x1   :  { %8 = vsyncpa [#allocation8], 0 }
   0x2   :  { %9 = vsyncpa [#allocation6], 0  ;;  %s207_s9 = smov [#allocation4]   ;;  %s147_s13 = scalar_lea.hbm %s263_s0, 256 }
   0x3   :  { %s21_s10 = sshll.u32 %s207_s9, 4  ;;  %p148_p0 = scmp.ne.s32.totalorder %s263_s0, %s147_s13  ;;  %s22_s10 = int_to_ptr.vmem [resolvable:$true] %s21_s10 }
   0x4   :  { %p151_p1 = scmp.lt.u32.totalorder %s147_s13, %s263_s0 }
   0x6   :  { %p153_p2 = pnand %p151_p1, %p148_p0 }
   0x8   :  { %156 = shalt.err (!%p153_p2)
}
   0x9   :  { %s157_s18 = scalar_lea.vmem %s22_s10, 256  ;;  %p162_p4 = scmp.lt.s32.totalorder %s22_s10, %s22_s10 }
   0xa   :  { %p158_p3 = scmp.ne.s32.totalorder %s22_s10, %s157_s18  ;;  %p163_p5 = scmp.lt.s32.totalorder %s157_s18, %s157_s18 }
   0xc   :  { %p164_p6 = por %p163_p5, %p162_p4 }
   0xe   :  { %p165_p7 = pnand %p164_p6, %p158_p3 }
  0x10   :  { %168 = shalt.err (!%p165_p7)
}
  0x11   :  { %s208_s19 = smov 128   ;;  %s209_s20 = smov 8  }
  0x12   :  { %27 = dma.hbm_to_vmem [thread:$0]  %s263_s0, 256, %s22_s10, [#allocation5], %s208_s19, %s208_s19, %s209_s20  }
  0x13   :  { %s210_s23 = smov [#allocation7]   ;;  %s169_s27 = scalar_lea.hbm %s264_s1, 256 }
  0x14   :  { %s39_s24 = sshll.u32 %s210_s23, 4  ;;  %p170_p8 = scmp.ne.s32.totalorder %s264_s1, %s169_s27  ;;  %s40_s24 = int_to_ptr.vmem [resolvable:$true] %s39_s24 }
  0x15   :  { %p173_p9 = scmp.lt.u32.totalorder %s169_s27, %s264_s1 }
  0x17   :  { %p175_p10 = pnand %p173_p9, %p170_p8 }
  0x19   :  { %178 = shalt.err (!%p175_p10)
}
  0x1a   :  { %s179_s4 = scalar_lea.vmem %s40_s24, 256  ;;  %p184_p12 = scmp.lt.s32.totalorder %s40_s24, %s40_s24 }
  0x1b   :  { %p180_p11 = scmp.ne.s32.totalorder %s40_s24, %s179_s4  ;;  %p185_p13 = scmp.lt.s32.totalorder %s179_s4, %s179_s4 }
  0x1d   :  { %p186_p0 = por %p185_p13, %p184_p12 }
  0x1f   :  { %p187_p1 = pnand %p186_p0, %p180_p11 }
  0x21   :  { %190 = shalt.err (!%p187_p1)
}
  0x22   :  { %45 = dma.hbm_to_vmem [thread:$0]  %s264_s1, 256, %s40_s24, [#allocation8], %s208_s19, %s208_s19, %s209_s20  }
  0x23   :  { %201 = dma.done.wait [#allocation5], 256  }
  0x24   :  { %202 = vsyncadd [#allocation5], 4294967040 }
  0x25   :  { %203 = dma.done.wait [#allocation8], 256  }
  0x26   :  { %204 = vsyncadd [#allocation8], 4294967040  ;;  %v68_v0 = vld [vmem:[#allocation4] sm:$0xff]  ;;  %v69_v1 = vld [vmem:[#allocation4 + $0x8] sm:$0xff]  ;;  %s191_s9 = scalar_lea.hbm %s265_s2, 16 }
  0x27   :  { %v70_v2 = vld [vmem:[#allocation7] sm:$0xff]  ;;  %v71_v3 = vld [vmem:[#allocation7 + $0x8] sm:$0xff]  ;;  %p192_p2 = scmp.ne.s32.totalorder %s265_s2, %s191_s9  ;;  %p195_p3 = scmp.lt.u32.totalorder %s191_s9, %s265_s2 }
  0x28   :  { %v74_v4 = vmul.f32 %v70_v2, %v68_v0  ;;  %v75_v5 = vmul.f32 %v71_v3, %v69_v1  ;;  %v82_v6 = vadd.f32 %v70_v2, %v68_v0  ;;  %v83_v7 = vadd.f32 %v71_v3, %v69_v1 }
  0x29   :  { %p197_p4 = pnand %p195_p3, %p192_p2 }
  0x2a   :  { %v93_v8 = vadd.f32 %v75_v5, %v74_v4  ;;  %v107_v9 = vadd.f32 %v83_v7, %v82_v6 }
  0x2c   :  { %94 = vadd.xlane.f32.xlu0 %v93_v8 }
  0x30   :  { %108 = vadd.xlane.f32.xlu0 %v107_v9 }
  0xb9   :  { %v95_v10 = vpop.xlane.xlu0 %94 }
  0xba   :  { %v96_v11 = vrot.slane %v95_v10, 4 }
  0xbc   :  { %v97_v12 = vadd.f32 %v96_v11, %v95_v10 }
  0xbd   :  { %v109_v13 = vpop.xlane.xlu0 %108 }
  0xbe   :  { %v98_v14 = vrot.slane %v97_v12, 2  ;;  %v110_v15 = vrot.slane %v109_v13, 4 }
  0xc0   :  { %v111_v16 = vadd.f32 %v110_v15, %v109_v13  ;;  %v99_v17 = vadd.f32 %v98_v14, %v97_v12 }
  0xc2   :  { %v112_v18 = vrot.slane %v111_v16, 2  ;;  %v100_v19 = vrot.slane %v99_v17, 1 }
  0xc4   :  { %v113_v20 = vadd.f32 %v112_v18, %v111_v16  ;;  %v101_v21 = vadd.f32 %v100_v19, %v99_v17 }
  0xc6   :  { %138 = vpush %v101_v21  ;;  %v114_v22 = vrot.slane %v113_v20, 1 }
  0xc8   :  { %v115_v23 = vadd.f32 %v114_v22, %v113_v20 }
  0xca   :  { %140 = vpush %v115_v23 }
  0xf7   :  { %s139_s1 = spop %138 }
  0xf8   :  { %104 = sst [smem:[#allocation9]] %s139_s1 }
  0xfb   :  { %s141_s6 = spop %140 }
  0xfc   :  { %118 = sst [smem:[#allocation9 + $0x1]] %s141_s6 }
  0xfd   :  { %200 = shalt.err (!%p197_p4)
}
  0xfe   :  { %s211_s14 = smov [#allocation9]  }
  0xff   :  { %126 = dma.smem_to_hbm %s211_s14, 16, %s265_s2, [#allocation6]  }
 0x100   :  { %205 = dma.done.wait [#allocation6], 16  }
 0x101   :  { %206 = vsyncadd [#allocation6], 4294967280 }
 0x102   :  { %130 = sfence }
 0x103   :  { %131 = vsyncpa [#allocation5], 1 }
 0x104   :  { %132 = vsyncpa [#allocation8], 1 }
 0x105   :  { %133 = vsyncpa [#allocation6], 1 }

</bundles_post_ra>
